<compile_context>
chip_gen: v6e
topology: v6e:2x2x1
jax: 0.10.0
libtpu: 0.0.40
codegen_flags: <defaults>
</compile_context>

<pallas_src>
import functools

import jax
import jax.numpy as jnp
from jax.experimental import pallas as pl
from jax.experimental.pallas import tpu as pltpu


@functools.lru_cache(maxsize=None)
def _budgets():
    """(block_budget_bytes, vmem_limit_bytes), generation-aware."""
    vmem_cap = None
    try:
        info = pltpu.get_tpu_info()
        vmem_cap = getattr(info, "vmem_capacity_bytes", None)
    except Exception:
        vmem_cap = None
    if not vmem_cap:
        vmem_cap = 64 * 1024 * 1024                # conservative: v7x per-TC
    if vmem_cap >= 96 * 1024 * 1024:               # v5e / v6e: 128 MiB VMEM
        return 16 * 1024 * 1024, 100 * 1024 * 1024
    return 6 * 1024 * 1024, 48 * 1024 * 1024       # v7x: 64 MiB / TC


# ---------------------------------------------------------------------------
# Fused path: one grid step per batch tile (per-batch (C, L) slab fits VMEM).
# ---------------------------------------------------------------------------
def _se_fused_kernel(x_ref, w1t_ref, w2t_ref, o_ref):
    # x_ref / o_ref: (bt, C, L); w1t_ref: (C, H) f32; w2t_ref: (H, C) f32.
    x = x_ref[...]                                  # native dtype, no fp32 tile copy
    inv_l = 1.0 / x.shape[-1]                       # block covers the full L extent

    # Squeeze: AdaptiveAvgPool1d(1) == mean over L (fp32 accumulation only).
    y = jnp.sum(x, axis=-1, dtype=jnp.float32) * inv_l                    # (bt, C)

    # Excite: Linear -> ReLU -> Linear -> Sigmoid (tiny, off the critical path).
    h = jnp.maximum(
        jnp.dot(y, w1t_ref[...], preferred_element_type=jnp.float32), 0.0)
    s = jax.nn.sigmoid(
        jnp.dot(h, w2t_ref[...], preferred_element_type=jnp.float32))     # (bt, C)

    # Scale in x's native dtype (slightly more rounding than f32 for bf16 x).
    o_ref[...] = (x * s.astype(x.dtype)[:, :, None]).astype(o_ref.dtype)


def _choose_batch_tile(batch, per_batch_bytes, max_block_bytes):
    """Largest batch tile that fits the block budget while keeping the grid at
    least min(batch, 8) steps deep (pipeline overlap / megacore balance)."""
    budget_bt = max(1, max_block_bytes // max(per_batch_bytes, 1))
    depth_bt = max(1, pl.cdiv(batch, min(batch, 8)))
    return max(1, min(batch, budget_bt, depth_bt))


def _se_fused(x, w1t, w2t, block_bytes, vmem_limit):
    B, C, L = x.shape
    H = w1t.shape[1]
    itemsize = jnp.dtype(x.dtype).itemsize
    bt = _choose_batch_tile(B, C * L * itemsize, block_bytes)
    grid = (pl.cdiv(B, bt),)

    cost = pl.CostEstimate(
        flops=4 * B * C * H + 2 * B * C * L,
        transcendentals=B * C,
        bytes_accessed=2 * B * C * L * itemsize + 2 * C * H * 4,
    )

    return pl.pallas_call(
        _se_fused_kernel,
        out_shape=jax.ShapeDtypeStruct((B, C, L), x.dtype),
        grid=grid,
        in_specs=[
            pl.BlockSpec((bt, C, L), lambda b: (b, 0, 0)),
            pl.BlockSpec((C, H), lambda b: (0, 0)),   # resident weights
            pl.BlockSpec((H, C), lambda b: (0, 0)),   # resident weights
        ],
        out_specs=pl.BlockSpec((bt, C, L), lambda b: (b, 0, 0)),
        compiler_params=pltpu.CompilerParams(
            dimension_semantics=("parallel",),
            vmem_limit_bytes=vmem_limit,
        ),
        cost_estimate=cost,
    )(x, w1t, w2t)


# ---------------------------------------------------------------------------
# Two-pass path (L tiled): used when a per-batch (C, L) slab exceeds the block
# budget.  Costs one extra read of x but bounds VMEM regardless of L.
# ---------------------------------------------------------------------------
def _se_gate_kernel(x_ref, w1t_ref, w2t_ref, gate_ref, sum_ref, *,
                    inv_l, l_total, tl):
    # x_ref: (1, C, tl); gate_ref: (1, C, 1) per-batch block; sum_ref: (1, C) f32.
    # NOTE: all program_id / num_programs binds stay at the top level (never
    # inside pl.when bodies) so the kernel also lowers in interpret mode.
    l = pl.program_id(1)
    n_l = pl.num_programs(1)

    @pl.when(l == 0)
    def _():
        sum_ref[...] = jnp.zeros_like(sum_ref)

    x = x_ref[...]
    if l_total % tl:  # static: last L tile is ragged -> mask its contribution
        lane = jax.lax.broadcasted_iota(jnp.int32, x_ref.shape, 2)
        x = jnp.where(l * tl + lane < l_total, x, 0)
    sum_ref[...] += jnp.sum(x, axis=-1, dtype=jnp.float32)

    @pl.when(l == n_l - 1)
    def _():
        y = sum_ref[...] * inv_l                                          # (1, C)
        h = jnp.maximum(
            jnp.dot(y, w1t_ref[...], preferred_element_type=jnp.float32), 0.0)
        s = jax.nn.sigmoid(
            jnp.dot(h, w2t_ref[...], preferred_element_type=jnp.float32))
        gate_ref[...] = s[:, :, None]                                     # (1, C, 1)


def _se_scale_kernel(gate_ref, x_ref, o_ref):
    # gate_ref: (1, C, 1) f32 (only this batch's row); x_ref / o_ref: (1, C, tl).
    x = x_ref[...]
    o_ref[...] = (x * gate_ref[...].astype(x.dtype)).astype(o_ref.dtype)


def _se_two_pass(x, w1t, w2t, tl, vmem_limit):
    B, C, L = x.shape
    H = w1t.shape[1]
    nl = pl.cdiv(L, tl)
    itemsize = jnp.dtype(x.dtype).itemsize

    # Pass 1: per-channel mean (reduction axis last, "arbitrary") -> gate (B, C, 1).
    # Batch axis is "parallel" with a per-batch output block so megacore can shard it.
    gate = pl.pallas_call(
        functools.partial(_se_gate_kernel, inv_l=1.0 / L, l_total=L, tl=tl),
        out_shape=jax.ShapeDtypeStruct((B, C, 1), jnp.float32),
        grid=(B, nl),
        in_specs=[
            pl.BlockSpec((1, C, tl), lambda b, l: (b, 0, l)),
            pl.BlockSpec((C, H), lambda b, l: (0, 0)),
            pl.BlockSpec((H, C), lambda b, l: (0, 0)),
        ],
        out_specs=pl.BlockSpec((1, C, 1), lambda b, l: (b, 0, 0)),
        scratch_shapes=[pltpu.VMEM((1, C), jnp.float32)],
        compiler_params=pltpu.CompilerParams(
            dimension_semantics=("parallel", "arbitrary"),
            vmem_limit_bytes=vmem_limit,
        ),
        cost_estimate=pl.CostEstimate(
            flops=B * C * L + 4 * B * C * H,
            transcendentals=B * C,
            bytes_accessed=B * C * L * itemsize,
        ),
    )(x, w1t, w2t)

    # Pass 2: scale every lane-dense (C, tl) tile by its batch's gate row.
    # (If profiling shows exposed DMA here, sweep pipeline_mode=pl.Buffered(3).)
    out = pl.pallas_call(
        _se_scale_kernel,
        out_shape=jax.ShapeDtypeStruct((B, C, L), x.dtype),
        grid=(B, nl),
        in_specs=[
            pl.BlockSpec((1, C, 1), lambda b, l: (b, 0, 0)),   # just this row's gate
            pl.BlockSpec((1, C, tl), lambda b, l: (b, 0, l)),
        ],
        out_specs=pl.BlockSpec((1, C, tl), lambda b, l: (b, 0, l)),
        compiler_params=pltpu.CompilerParams(
            dimension_semantics=("parallel", "parallel"),
            vmem_limit_bytes=vmem_limit,
        ),
        cost_estimate=pl.CostEstimate(
            flops=B * C * L,
            transcendentals=0,
            bytes_accessed=2 * B * C * L * itemsize,
        ),
    )(gate, x)
    return out


# ---------------------------------------------------------------------------
# Public wrapper
# ---------------------------------------------------------------------------
def se_layer(x, w1, w2, *, max_block_bytes=None, vmem_limit_bytes=None):
    """x: (B, C, L); w1: (H, C); w2: (C, H) (torch.nn.Linear convention, no bias)."""
    B, C, L = x.shape
    del B
    default_block, default_limit = _budgets()
    block_bytes = max_block_bytes if max_block_bytes is not None else default_block
    vmem_limit = vmem_limit_bytes if vmem_limit_bytes is not None else default_limit

    # Weight transpose + dtype cast hoisted out of the kernels (done once; the
    # weight blocks are resident in VMEM across the grid).
    w1t = jnp.transpose(w1).astype(jnp.float32)   # (C, H)
    w2t = jnp.transpose(w2).astype(jnp.float32)   # (H, C)

    itemsize = jnp.dtype(x.dtype).itemsize
    per_batch_bytes = C * L * itemsize

    if per_batch_bytes <= block_bytes:
        return _se_fused(x, w1t, w2t, block_bytes, vmem_limit)

    # L-tiled fallback: largest lane-dense (multiple of 128) tile in budget; the
    # tile does not need to divide L (ragged last tile is masked in-kernel).
    tl = max(128, (block_bytes // (C * itemsize)) // 128 * 128)
    tl = min(tl, pl.cdiv(L, 128) * 128)
    return _se_two_pass(x, w1t, w2t, tl, vmem_limit)


def se_layer_ref(x, w1, w2):
    """Pure-JAX reference mirroring the PyTorch forward."""
    y = jnp.mean(x, axis=-1)                  # AdaptiveAvgPool1d(1) + view(b, -1)
    y = jnp.maximum(y @ w1.T, 0.0)            # Linear(channel, hidden) + ReLU
    y = jax.nn.sigmoid(y @ w2.T)              # Linear(hidden, channel) + Sigmoid
    return x * y[:, :, None]                  # x * y.expand_as(x)


if __name__ == "__main__":
    # Module config: channel=4, reduction=16 -> channel < reduction,
    # so hidden_neurons = channel // 2 = 2.
    reduction = 16

    # Test 1: fused path at the module's demo shape.
    B, C, L = 2, 4, 16
    H = C // 2 if C < reduction else C // reduction
    key = jax.random.PRNGKey(0)
    kx, k1, k2 = jax.random.split(key, 3)
    x = jax.random.normal(kx, (B, C, L), dtype=jnp.float32)
    w1 = jax.random.normal(k1, (H, C), dtype=jnp.float32) * 0.5   # fc[0].weight
    w2 = jax.random.normal(k2, (C, H), dtype=jnp.float32) * 0.5   # fc[2].weight
    out = jax.block_until_ready(se_layer(x, w1, w2))
    ref = se_layer_ref(x, w1, w2)
    assert out.shape == (B, C, L)
    assert jnp.allclose(out, ref, atol=1e-5, rtol=1e-5), "fused path mismatch"

    # Test 2: two-pass (L-tiled) fallback with a ragged last L tile
    # (L=640, tl=256 -> 3 tiles, last masked), via a small block budget.
    B2, C2, L2 = 2, 8, 640
    H2 = C2 // 2 if C2 < reduction else C2 // reduction
    kx2, k3, k4 = jax.random.split(jax.random.PRNGKey(1), 3)
    x2 = jax.random.normal(kx2, (B2, C2, L2), dtype=jnp.float32)
    w1b = jax.random.normal(k3, (H2, C2), dtype=jnp.float32) * 0.5
    w2b = jax.random.normal(k4, (C2, H2), dtype=jnp.float32) * 0.5
    out2 = jax.block_until_ready(se_layer(x2, w1b, w2b, max_block_bytes=8 * 1024))
    ref2 = se_layer_ref(x2, w1b, w2b)
    assert jnp.allclose(out2, ref2, atol=1e-5, rtol=1e-5), "two-pass path mismatch"

    # Test 3: fused path with a cdiv batch grid (B=20 -> bt=3, 7 steps, ragged last).
    B3, C3, L3 = 20, 8, 256
    H3 = C3 // 2 if C3 < reduction else C3 // reduction
    kx3, k5, k6 = jax.random.split(jax.random.PRNGKey(2), 3)
    x3 = jax.random.normal(kx3, (B3, C3, L3), dtype=jnp.float32)
    w1c = jax.random.normal(k5, (H3, C3), dtype=jnp.float32) * 0.5
    w2c = jax.random.normal(k6, (C3, H3), dtype=jnp.float32) * 0.5
    out3 = jax.block_until_ready(se_layer(x3, w1c, w2c))
    ref3 = se_layer_ref(x3, w1c, w2c)
    assert jnp.allclose(out3, ref3, atol=1e-5, rtol=1e-5), "ragged-batch fused mismatch"

    print("KERNEL_OK")
</pallas_src>

<mosaic_0001>
module attributes {stable_mosaic.version = 11 : i64} {
  func.func @_se_fused_kernel(%arg0: i32, %arg1: memref<1x4x16xf32, #tpu.memory_space<vmem>>, %arg2: memref<4x2xf32, #tpu.memory_space<vmem>>, %arg3: memref<2x4xf32, #tpu.memory_space<vmem>>, %arg4: memref<1x4x16xf32, #tpu.memory_space<vmem>>) attributes {dimension_semantics = [#tpu.dimension_semantics<parallel>], iteration_bounds = array<i64: 2>, scalar_prefetch = 0 : i64, scratch_operands = 0 : i64, tpu.core_type = #tpu.core_type<tc>, window_params = [{transform_indices = @transform_0, window_bounds = array<i64: 1, 4, 16>}, {pipeline_mode = #tpu.pipeline_mode<synchronous>, transform_indices = @transform_1, window_bounds = array<i64: 4, 2>}, {pipeline_mode = #tpu.pipeline_mode<synchronous>, transform_indices = @transform_2, window_bounds = array<i64: 2, 4>}, {transform_indices = @transform_3, window_bounds = array<i64: 1, 4, 16>}]} {
    %c0 = arith.constant 0 : index
    %c0_0 = arith.constant 0 : index
    %c0_1 = arith.constant 0 : index
    %0 = vector.load %arg1[%c0, %c0_0, %c0_1] : memref<1x4x16xf32, #tpu.memory_space<vmem>>, vector<1x4x16xf32>
    %cst = arith.constant dense<0.000000e+00> : vector<1x4xf32>
    %1 = vector.multi_reduction <add>, %0, %cst [2] : vector<1x4x16xf32> to vector<1x4xf32>
    %cst_2 = arith.constant 6.250000e-02 : f32
    %2 = vector.broadcast %cst_2 : f32 to vector<1x4xf32>
    %3 = arith.mulf %1, %2 : vector<1x4xf32>
    %c0_3 = arith.constant 0 : index
    %c0_4 = arith.constant 0 : index
    %4 = vector.load %arg2[%c0_3, %c0_4] : memref<4x2xf32, #tpu.memory_space<vmem>>, vector<4x2xf32>
    %cst_5 = arith.constant dense<0.000000e+00> : vector<1x2xf32>
    %5 = tpu.matmul %3, %4, %cst_5 {dimension_numbers = #tpu.dot_dimension_numbers<[1], [0], [0], [1], [0, 0, 1, 1], [], []>} : vector<1x4xf32>, vector<4x2xf32>, vector<1x2xf32> -> vector<1x2xf32>
    %cst_6 = arith.constant 0.000000e+00 : f32
    %6 = vector.broadcast %cst_6 : f32 to vector<1x2xf32>
    %7 = arith.maximumf %5, %6 : vector<1x2xf32>
    %c0_7 = arith.constant 0 : index
    %c0_8 = arith.constant 0 : index
    %8 = vector.load %arg3[%c0_7, %c0_8] : memref<2x4xf32, #tpu.memory_space<vmem>>, vector<2x4xf32>
    %cst_9 = arith.constant dense<0.000000e+00> : vector<1x4xf32>
    %9 = tpu.matmul %7, %8, %cst_9 {dimension_numbers = #tpu.dot_dimension_numbers<[1], [0], [0], [1], [0, 0, 1, 1], [], []>} : vector<1x2xf32>, vector<2x4xf32>, vector<1x4xf32> -> vector<1x4xf32>
    %10 = arith.negf %9 : vector<1x4xf32>
    %11 = math.exp %10 : vector<1x4xf32>
    %cst_10 = arith.constant 1.000000e+00 : f32
    %12 = vector.broadcast %cst_10 : f32 to vector<1x4xf32>
    %13 = arith.addf %12, %11 : vector<1x4xf32>
    %14 = arith.divf %12, %13 : vector<1x4xf32>
    %15 = vector.shape_cast %14 : vector<1x4xf32> to vector<1x4x1xf32>
    %16 = vector.broadcast %15 : vector<1x4x1xf32> to vector<1x4x16xf32>
    %17 = arith.mulf %0, %16 : vector<1x4x16xf32>
    %c0_11 = arith.constant 0 : index
    %c0_12 = arith.constant 0 : index
    %c0_13 = arith.constant 0 : index
    %18 = vector.load %arg4[%c0_11, %c0_12, %c0_13] : memref<1x4x16xf32, #tpu.memory_space<vmem>>, vector<1x4x16xf32>
    tpu.vector_store %arg4[%c0_11, %c0_12, %c0_13], %17 {strides = array<i32>} : memref<1x4x16xf32, #tpu.memory_space<vmem>>, vector<1x4x16xf32>,
    return
  }
  func.func @transform_0(%arg0: i32) -> (i32, i32, i32) {
    %c0_i32 = arith.constant 0 : i32
    %c0_i32_0 = arith.constant 0 : i32
    %c0_i32_1 = arith.constant 0 : i32
    return %arg0, %c0_i32, %c0_i32_0 : i32, i32, i32
  }
  func.func @transform_1(%arg0: i32) -> (i32, i32) {
    %c0_i32 = arith.constant 0 : i32
    %c0_i32_0 = arith.constant 0 : i32
    %c0_i32_1 = arith.constant 0 : i32
    return %c0_i32, %c0_i32_0 : i32, i32
  }
  func.func @transform_2(%arg0: i32) -> (i32, i32) {
    %c0_i32 = arith.constant 0 : i32
    %c0_i32_0 = arith.constant 0 : i32
    %c0_i32_1 = arith.constant 0 : i32
    return %c0_i32, %c0_i32_0 : i32, i32
  }
  func.func @transform_3(%arg0: i32) -> (i32, i32, i32) {
    %c0_i32 = arith.constant 0 : i32
    %c0_i32_0 = arith.constant 0 : i32
    %c0_i32_1 = arith.constant 0 : i32
    return %arg0, %c0_i32, %c0_i32_0 : i32, i32, i32
  }
}

</mosaic_0001>

<bundles_post_ra>
// kernel: tpu_custom_call.1
= control target key start
LH: loop header
LB: loop body
LE: loop exit
PB: predicated region body
PF: predicated region fallthrough
CT: control target
= control target key end

     0   :  { %8 = vsyncpa [#allocation3], 0  ;;  %s810_s0 = inlined_call_operand.hbm [shape: f32[2,4,16], index: 0, kind: input, shape index: {}]   ;;  %s811_s1 = inlined_call_operand.vmem [shape: f32[4,2], index: 1, kind: input, shape index: {}]   ;;  %s812_s2 = inlined_call_operand.vmem [shape: f32[2,4], index: 2, kind: input, shape index: {}]   ;;  %s813_s3 = inlined_call_operand.hbm [shape: f32[2,4,16], index: 3, kind: output, shape index: {}]  }
   0x1   :  { %10 = vsyncpa [#allocation3 + $0x1], 0 }
   0x2   :  { %11 = vsyncpa [#allocation4], 0 }
   0x3   :  { %13 = vsyncpa [#allocation4 + $0x1], 0  ;;  %s657_s12 = smov 0   ;;  %s659_s13 = smov 0  }
   0x4   :  { %s661_s14 = smov 0   ;;  %s663_s15 = smov 0  }
   0x5 LB: > { %s678_s16 = sadd.s32 4294967295, %s631_s15   ;;  %s456_s17 = sadd.s32 4294967294, %s631_s15   ;;  %s631_s15 = sphi %s663_s15, %s830_s15   ;;  %s627_s14 = sphi %s661_s14, %s829_s14   ;;  %s623_s13 = sphi %s659_s13, %s828_s13   ;;  %s619_s12 = sphi %s657_s12, %s827_s12  }
   0x6   : > { %s682_s18 = sadd.s32 1, %s631_s15   ;;  %s26_s19 = sadd.s32 1, %s627_s14 }
   0x7   : > { %s23_s20 = ssub.s32 %s631_s15, %s682_s18  ;;  %p33_p0 = scmp.ne.s32.totalorder %s627_s14, %s623_s13 }
   0x8   : > { %p24_p1 = scmp.eq.s32.totalorder %s23_s20, 0  ;;  %p34_p2 = scmp.eq.s32.totalorder %s631_s15, 0 }
   0x9   : > { %p39_p3 = scmp.ne.s32.totalorder %s623_s13, %s619_s12  ;;  %p40_p4 = scmp.eq.s32.totalorder %s678_s16, 0 }
   0xa   : > { %s694_s21 = scalar_select %p24_p1, %s627_s14, %s26_s19  }
   0xb   : > { %p696_p5 = por %p34_p2, %p33_p0  ;;  %p700_p6 = por %p40_p4, %p39_p3 }
   0xc   : > { %p105_p7 = scmp.eq.s32.totalorder %s678_s16, 1  ;;  %p111_p8 = scmp.eq.s32.totalorder %s456_s17, 1 }
   0xd   : > { %s817_s23 = scalar_select %p700_p6, 1, 0 }
   0xe   : > { %p499_p10 = scmp.lt.s32.totalorder %s631_s15, 2  ;;  %p707_p11 = por %p105_p7, %p33_p0 }
   0xf   : > { %p711_p12 = por %p111_p8, %p39_p3  ;;  %s137_s26 = sand.u32 1, %s627_s14  }
  0x10   : > { %s818_s24 = scalar_select %p707_p11, 1, 0 }
  0x11   : > { %s819_s25 = scalar_select %p711_p12, 1, 0 }
  0x12   : > { %s460_s27 = sshll.u32 %s631_s15, 6  ;;  %s459_s28 = sshll.u32 %s137_s26, 2 }
  0x13   : > { %s720_s4 = scalar_lea.hbm %s810_s0, %s460_s27  ;;  %s141_s5 = scalar_lea.vmem [#allocation2], %s459_s28 }
  0x14   : > { %s148_s6 = sshll.u32 %s141_s5, 4  ;;  %p724_p13 = pnand %p499_p10, %p696_p5  ;;  %s728_s6 = int_to_ptr.vmem [resolvable:$true] %s148_s6 }
  0x15   : > { %s138_s8 = scalar_lea.sflag [#allocation3], %s137_s26  ;;  %s539_s9 = scalar_lea.hbm %s720_s4, 64 }
  0x16   : > { %p540_p2 = scmp.ne.s32.totalorder %s720_s4, %s539_s9  ;;  %p541_p3 = pneg %p724_p13 }
  0x17   : > { %s544_s17 = scalar_lea.hbm %s810_s0, 128  ;;  %p545_p5 = scmp.lt.s32.totalorder %s720_s4, %s810_s0 }
  0x18   : > { %p542_p4 = pnand %p541_p3, %p540_p2  ;;  %p546_p8 = scmp.lt.s32.totalorder %s544_s17, %s539_s9 }
  0x1a   : > { %p543_p7 = pneg %p542_p4  ;;  %p547_p10 = por %p546_p8, %p545_p5 }
  0x1c   : > { %p548_p9 = pnand %p547_p10, %p543_p7 }
  0x1e   : > { %551 = shalt.err (!%p548_p9)
}
  0x1f   : > { %s552_s22 = scalar_lea.vmem %s728_s6, 64  ;;  %s633_s26 = smov [#allocation2]  }
  0x20   : > { %p553_p0 = scmp.ne.s32.totalorder %s728_s6, %s552_s22  ;;  %s557_s27 = sshll.u32 %s633_s26, 4  ;;  %s558_s27 = int_to_ptr.vmem [resolvable:$false] %s557_s27 }
  0x21   : > { %s559_s28 = scalar_lea.vmem %s558_s27, 128  ;;  %p560_p4 = scmp.lt.s32.totalorder %s728_s6, %s558_s27 }
  0x22   : > { %p555_p1 = pnand %p553_p0, %p541_p3  ;;  %p561_p12 = scmp.lt.s32.totalorder %s559_s28, %s552_s22 }
  0x24   : > { %p556_p2 = pneg %p555_p1  ;;  %p562_p11 = por %p561_p12, %p560_p4 }
  0x26   : > { %p563_p6 = pnand %p562_p11, %p556_p2 }
  0x28   : > { %566 = shalt.err (!%p563_p6)
}
  0x29   : > { %494 = dma.hbm_to_vmem [thread:$0]  (!%p724_p13), %s720_s4, 64, %s728_s6, %s138_s8  }
  0x2a   : > { %p821_p9 = scmp.lt.s32.totalorder %s631_s15, 3  ;;  %p822_p7 = scmp.ge.s32.totalorder %s631_s15, 1 }
  0x2c   : > { %p154_p0 = pnand %p822_p7, %p821_p9 }
  0x2d   : > { %s755_s29 = sand.u32 (!%p154_p0), 1, %s623_s13   ;;  %p823_p6 = scmp.ne.s32.totalorder (!%p154_p0), %s817_s23, 0 }
  0x2e   : > { %157 = sbr.rel (%p154_p0) target bundleno = 748 (0x2ec), region = 32  ;;  %s462_s30 = sshll.u32 (!%p154_p0), %s755_s29, 2 }
  0x2f   : > { %s160_s5 = scalar_lea.sflag (!%p154_p0), [#allocation3], %s755_s29  ;;  %s163_s7 = scalar_lea.vmem (!%p154_p0), [#allocation2], %s462_s30 }
  0x33   : > { %610 = dma.done.wait (%p823_p6), %s160_s5, 64  }
  0x34   : > { %612 = vsyncadd (%p823_p6), %s160_s5, 4294967232  ;;  %vm187_vm0 = vcmask 125952   ;;  %v186_v0 = vld [vmem:[%s163_s7] sm:$0xf]  ;;  %v634_v2 = vmov 0.0   ;;  %vm203_vm1 = vcmask 1043456   ;;  %v194_v4 = vlaneseq }
  0x35   : > { %v188_v1 = vsel %vm187_vm0, %v186_v0, 0.0  ;;  %477 = vmatprep.subr.mxu0 %v634_v2  ;;  %v192_v3 = vld [vmem:[%s811_s1] sm:$0xf]  ;;  %482 = vmatprep.subr.mxu1 %v634_v2  ;;  %vm635_vm2 = vmmov 0   ;;  %vm200_vm3 = vcmask 31744   ;;  %vm283_vm4 = vcmask 1041408  }
  0x36   : > { %189 = vadd.xlane.f32.xlu0 %v188_v1  ;;  %478 = vmatpush3.msk.msra.mxu0 %vm203_vm1, %v192_v3  ;;  %v195_v5 = vand.u32 127, %v194_v4  ;;  %v197_v6 = vshrl.u32 %v194_v4, 7  ;;  %v278_v11 = vld [vmem:[%s812_s2] sm:$0x3]  ;;  %vm279_vm5 = vcmask 15360   ;;  %s470_s9 = sshll.u32 %s678_s16, 6 }
  0x37   : > { %479 = vmatprep.mubr.msk.f32.mxu0 %vm635_vm2, %v634_v2  ;;  %484 = vmatprep.mubr.msk.f32.mxu1 %vm635_vm2, %v634_v2  ;;  %s185_s10 = scalar_lea.vmem [#allocation5], %s462_s30  ;;  %s384_s20 = scalar_lea.hbm %s813_s3, %s470_s9 }
  0x38   : > { %v198_v7 = vsub.s32 %v195_v5, %v197_v6  ;;  %483 = vmatpush3.msk.msra.mxu1 %vm283_vm4, %v278_v11  ;;  %v365_v20 = vsub.s32 0, %v197_v6  ;;  %s386_s11 = sshll.u32 %s185_s10, 4  ;;  %s373_s22 = scalar_lea.sflag [#allocation4], %s755_s29  ;;  %s387_s11 = int_to_ptr.vmem [resolvable:$true] %s386_s11 }
  0x39   : > { %s567_s26 = scalar_lea.vmem %s387_s11, 64  ;;  %p824_p12 = scmp.ne.s32.totalorder %s818_s24, 0 }
  0x3a   : > { %p568_p11 = scmp.ne.s32.totalorder %s387_s11, %s567_s26  ;;  %s636_s27 = smov [#allocation5]  }
  0x3b   : > { %s571_s16 = sshll.u32 %s636_s27, 4  ;;  %s572_s16 = int_to_ptr.vmem [resolvable:$false] %s571_s16 }
  0x3c   : > { %p569_p13 = pnand %p568_p11, %p824_p12  ;;  %s573_s28 = scalar_lea.vmem %s572_s16, 128 }
  0x3d   : > { %p574_p3 = scmp.lt.s32.totalorder %s387_s11, %s572_s16  ;;  %p575_p5 = scmp.lt.s32.totalorder %s573_s28, %s567_s26 }
  0x3e   : > { %p570_p1 = pneg %p569_p13 }
  0x3f   : > { %p576_p8 = por %p575_p5, %p574_p3 }
  0x41   : > { %p577_p10 = pnand %p576_p8, %p570_p1 }
  0xbf   : > { %v190_v8 = vpop.xlane.xlu0 %189 }
  0xc0   : > { %v191_v9 = vmul.f32 0.0625, %v190_v8 }
  0xc2   : > { %v199_v10 = vrot.slane %v191_v9, %v198_v7 }
  0xc4   : > { %480 = vmatmul.mubr.msk.f32.vlgmr.msra.gmra.mxu0 %vm200_vm3, %v199_v10 }
 0x184   : > { %v273_v12 = vpop.f32.mrf.mxu0 }
 0x185   : > { %v277_v13 = vmax.f32 %v273_v12, 0.0 }
 0x186   : > { %v481_v14 = vpop.f32.mrf.mxu0 }
 0x187   : > { %485 = vmatmul.mubr.msk.f32.vlgmr.msra.gmra.mxu1 %vm279_vm5, %v277_v13 }
 0x247   : > { %v353_v15 = vpop.f32.mrf.mxu1 }
 0x248   : > { %v468_v16 = vmul.f32 -1.442695, %v353_v15 }
 0x249   : > { %v486_v17 = vpop.f32.mrf.mxu1 }
 0x24a   : > { %535 = vpow2.f32 %v468_v16 }
 0x257   : > { %v536_v18 = vpop.eup %535 }
 0x258   : > { %v360_v19 = vadd.f32 1.0, %v536_v18 }
 0x25a   : > { %537 = vrcp.f32 %v360_v19 }
 0x267   : > { %v538_v21 = vpop.eup %537 }
 0x268   : > { %v366_v22 = vrot.slane %v538_v21, %v365_v20 }
 0x26a   : > { %368 = vbcast.lane.b32.xlu0 %v366_v22, 256 }
 0x2dc   : > { %v369_v23 = vpop.permute.xlu0 %368 }
 0x2dd   : > { %v370_v24 = vmul.f32 %v369_v23, %v186_v0 }
 0x2df   : > { %371 = vst.msk [vmem:[%s185_s10] sm:$0xf] %vm187_vm0, %v370_v24 }
 0x2e0   : > { %580 = shalt.err (!%p577_p10)
}
 0x2e1   : > { %s581_s30 = scalar_lea.hbm %s384_s20, 64  ;;  %s585_s7 = scalar_lea.hbm %s813_s3, 128 }
 0x2e2   : > { %p582_p2 = scmp.ne.s32.totalorder %s384_s20, %s581_s30  ;;  %p586_p7 = scmp.lt.s32.totalorder %s384_s20, %s813_s3 }
 0x2e3   : > { %p587_p0 = scmp.lt.s32.totalorder %s585_s7, %s581_s30 }
 0x2e4   : > { %p583_p4 = pnand %p582_p2, %p824_p12 }
 0x2e5   : > { %p588_p6 = por %p587_p0, %p586_p7 }
 0x2e6   : > { %p584_p9 = pneg %p583_p4 }
 0x2e8   : > { %p589_p11 = pnand %p588_p6, %p584_p9 }
 0x2ea   : > { %592 = shalt.err (!%p589_p11)
}
 0x2eb   : > { %489 = dma.vmem_to_hbm [thread:$0]  (%p824_p12), %s387_s11, 64, %s384_s20, %s373_s22  }
 0x2ec PF: > { %s398_s23 = sand.u32 1, %s619_s12   ;;  %p825_p13 = scmp.ne.s32.totalorder %s819_s25, 0 }
 0x2ed   : > { %p826_p1 = scmp.ge.s32.totalorder %s631_s15, 2  ;;  %s399_s8 = scalar_lea.sflag [#allocation4], %s398_s23 }
 0x2ef   : > { %p496_p3 = pnand %p826_p1, %p825_p13 }
 0x2f1   : > { %p497_p5 = pneg %p496_p3 }
 0x2f3   : > { %614 = dma.done.wait (%p497_p5), %s399_s8, 64  }
 0x2f4   : > { %616 = vsyncadd (%p497_p5), %s399_s8, 4294967232  ;;  %p16_p8 = scmp.ge.s32.totalorder %s682_s18, 4   ;;  %s827_s12 = smov %s623_s13 }
 0x2f5   : > { %s828_s13 = smov %s627_s14  ;;  %s829_s14 = smov %s694_s21 }
 0x2f6   : > { %s830_s15 = smov %s682_s18  ;;  %18 = sbr.rel (!%p16_p8) target bundleno = 5 (0x5), region = 77 }
 0x2fb   :  { %404 = vsyncpa [#allocation3], 1 }
 0x2fc   :  { %406 = vsyncpa [#allocation3 + $0x1], 1 }
 0x2fd   :  { %407 = vsyncpa [#allocation4], 1 }
 0x2fe   :  { %409 = vsyncpa [#allocation4 + $0x1], 1 }

</bundles_post_ra>
